<compile_context>
chip_gen: v6e
topology: v6e:2x2x1
jax: 0.10.0
libtpu: 0.0.40
codegen_flags: <defaults>
</compile_context>

<pallas_src>
import functools

import numpy as np
import jax
import jax.numpy as jnp
from jax.experimental import pallas as pl
from jax.experimental.pallas import tpu as pltpu


_MXU_DTYPE = jnp.bfloat16  # MXU inputs in bf16: 2x matmul rate, half the matrix traffic.


def _pick_tile(dim, pref, align):
    """Largest multiple of `align` <= `pref` that divides `dim`, else the full dim.

    Keeps every BlockSpec dim either a multiple of the (8,128) tile or equal to the array dim.
    """
    if dim <= pref:
        return dim
    t = (pref // align) * align
    while t >= align:
        if dim % t == 0:
            return t
        t -= align
    return dim


# ----------------------------------------------------------------------------
# generic tiled 2-D matmul (used by the two resize stages)
# ----------------------------------------------------------------------------
def _mm_kernel(a_ref, b_ref, o_ref, acc_ref):
    @pl.when(pl.program_id(2) == 0)
    def _():
        acc_ref[...] = jnp.zeros_like(acc_ref)

    acc_ref[...] += jnp.dot(a_ref[...].astype(_MXU_DTYPE),
                            b_ref[...].astype(_MXU_DTYPE),
                            preferred_element_type=jnp.float32)

    @pl.when(pl.program_id(2) == pl.num_programs(2) - 1)
    def _():
        o_ref[...] = acc_ref[...].astype(o_ref.dtype)


def pallas_matmul(a, b, out_dtype=None, tm=256, tn=512, tk=512):
    M, K = a.shape
    K2, N = b.shape
    assert K == K2
    out_dtype = out_dtype if out_dtype is not None else a.dtype
    tm = _pick_tile(M, tm, 8)
    tn = _pick_tile(N, tn, 128)
    tk = _pick_tile(K, tk, 128)
    grid = (M // tm, N // tn, K // tk)
    return pl.pallas_call(
        _mm_kernel,
        out_shape=jax.ShapeDtypeStruct((M, N), out_dtype),
        grid=grid,
        in_specs=[pl.BlockSpec((tm, tk), lambda i, j, k: (i, k)),
                  pl.BlockSpec((tk, tn), lambda i, j, k: (k, j))],
        out_specs=pl.BlockSpec((tm, tn), lambda i, j, k: (i, j)),
        scratch_shapes=[pltpu.VMEM((tm, tn), jnp.float32)],
        compiler_params=pltpu.CompilerParams(
            dimension_semantics=("parallel", "parallel", "arbitrary")),
    )(a, b)


# ----------------------------------------------------------------------------
# hflip / identity: pure data movement, done wrapper-side in XLA (review item)
# ----------------------------------------------------------------------------
def hflip_aug(x):
    # Bit-exact lane reverse; no MXU work, no extra matrix DMA, no bf16 cast of x.
    return jnp.flip(x, axis=-1)


# ----------------------------------------------------------------------------
# random crop: DMA-only kernel, offsets via scalar prefetch (review item)
# ----------------------------------------------------------------------------
def _crop_kernel(ty_ref, tx_ref, x_hbm, o_ref, sem):
    n = pl.program_id(0)
    s = o_ref.shape[2]
    ty = ty_ref[n]
    tx = tx_ref[n]
    cp = pltpu.make_async_copy(
        x_hbm.at[n, :, pl.ds(ty, s), pl.ds(tx, s)],   # strided HBM window
        o_ref.at[0],                                  # (C, s, s) VMEM output block
        sem.at[0])
    cp.start()
    cp.wait()


def crop_aug(x, ty, tx, s):
    N, C, H, W = x.shape
    grid_spec = pltpu.PrefetchScalarGridSpec(
        num_scalar_prefetch=2,
        grid=(N,),
        in_specs=[pl.BlockSpec(memory_space=pl.ANY)],     # x stays in HBM; we DMA the window only
        out_specs=pl.BlockSpec((1, C, s, s), lambda n, ty_r, tx_r: (n, 0, 0, 0)),
        scratch_shapes=[pltpu.SemaphoreType.DMA((1,))],
    )
    return pl.pallas_call(
        _crop_kernel,
        out_shape=jax.ShapeDtypeStruct((N, C, s, s), x.dtype),
        grid_spec=grid_spec,
        compiler_params=pltpu.CompilerParams(dimension_semantics=("arbitrary",)),
    )(jnp.asarray(ty, jnp.int32), jnp.asarray(tx, jnp.int32), x)


# ----------------------------------------------------------------------------
# RandomResizedCrop (scale=(1,1)) == full-image bilinear resize: two big 2-D matmuls
# ----------------------------------------------------------------------------
def resize_aug(x, a, bt):
    """out[b] = A @ x[b] @ Bt for every b in N*C, expressed as two lane-dense 2-D matmuls."""
    N, C, H, W = x.shape
    Ho, Wo = a.shape[0], bt.shape[1]
    B = N * C
    # Layout plumbing in XLA (not compute): present lane-dense slabs to the MXU kernels.
    xt = jnp.transpose(x.reshape(B, H, W), (1, 0, 2)).reshape(H, B * W)    # (H, B*W)
    u = pallas_matmul(a, xt, out_dtype=x.dtype)                            # (Ho, B*W)
    ut = jnp.transpose(u.reshape(Ho, B, W), (1, 0, 2)).reshape(B * Ho, W)  # (B*Ho, W)
    out = pallas_matmul(ut, bt, out_dtype=x.dtype)                         # (B*Ho, Wo)
    return out.reshape(N, C, Ho, Wo)


# ----------------------------------------------------------------------------
# rotation: K-tiled dense bilinear resampling operator (f32 accumulator)
# ----------------------------------------------------------------------------
def _rotate_kernel(x_ref, st_ref, o_ref, acc_ref):
    @pl.when(pl.program_id(1) == 0)
    def _():
        acc_ref[...] = jnp.zeros_like(acc_ref)

    acc_ref[...] += jnp.dot(x_ref[0].astype(_MXU_DTYPE), st_ref[0],
                            preferred_element_type=jnp.float32)

    @pl.when(pl.program_id(1) == pl.num_programs(1) - 1)
    def _():
        o_ref[0] = acc_ref[...].astype(o_ref.dtype)
    # TODO(synk): replace the dense O((H*W)^2) operator with an in-kernel 4-tap bilinear gather
    # once a robust dynamic 2-D gather is available; the dense form is St-DMA-bound at large sizes.


def rotate_aug(x, st):
    N, C, H, W = x.shape
    HW = H * W
    xf = x.reshape(N, C, HW)
    tk = _pick_tile(HW, 512, 128)         # K-tile keeps double-buffered St tiles small (v7x 64 MiB)
    kt = HW // tk
    out = pl.pallas_call(
        _rotate_kernel,
        out_shape=jax.ShapeDtypeStruct((N, C, HW), x.dtype),
        grid=(N, kt),
        in_specs=[pl.BlockSpec((1, C, tk), lambda n, k: (n, 0, k)),
                  pl.BlockSpec((1, tk, HW), lambda n, k: (n, k, 0))],
        out_specs=pl.BlockSpec((1, C, HW), lambda n, k: (n, 0, 0)),
        scratch_shapes=[pltpu.VMEM((C, HW), jnp.float32)],
        compiler_params=pltpu.CompilerParams(
            dimension_semantics=("parallel", "arbitrary")),
    )(xf, st)
    return out.reshape(N, C, H, W)


# ----------------------------------------------------------------------------
# noise (gaussian / speckle): tiled, lane-dense, in-kernel HW PRNG when available
# ----------------------------------------------------------------------------
def _noise_prng_kernel(seed_ref, x_ref, o_ref, *, scale, multiplicative):
    # independent stream per grid block
    pltpu.prng_seed(seed_ref[0]
                    + pl.program_id(0) * pl.num_programs(1)
                    + pl.program_id(1))
    x = x_ref[...]
    n = pltpu.stateful_normal(x.shape, jnp.float32).astype(x.dtype) * scale
    o_ref[...] = (x + (x * n if multiplicative else n)).astype(o_ref.dtype)


def _noise_ext_kernel(x_ref, n_ref, o_ref, *, scale, multiplicative):
    x = x_ref[...]
    n = n_ref[...] * scale
    o_ref[...] = (x + (x * n if multiplicative else n)).astype(o_ref.dtype)


def _noise_tiling(N, feat):
    rb = _pick_tile(N, 128, 8)
    fb = _pick_tile(feat, 2048, 128)      # 512-2048 lane blocks reach >=85% of HBM roofline
    return rb, fb, (N // rb, feat // fb)


def _noise_prng_pallas(xf, seed, scale, multiplicative):
    N, feat = xf.shape
    rb, fb, grid = _noise_tiling(N, feat)
    kernel = functools.partial(_noise_prng_kernel, scale=float(scale),
                               multiplicative=bool(multiplicative))
    return pl.pallas_call(
        kernel,
        out_shape=jax.ShapeDtypeStruct((N, feat), xf.dtype),
        grid_spec=pltpu.PrefetchScalarGridSpec(
            num_scalar_prefetch=1,
            grid=grid,
            in_specs=[pl.BlockSpec((rb, fb), lambda i, j, s: (i, j))],
            out_specs=pl.BlockSpec((rb, fb), lambda i, j, s: (i, j)),
        ),
        compiler_params=pltpu.CompilerParams(
            dimension_semantics=("parallel", "parallel")),
    )(jnp.asarray([seed], jnp.int32), xf)


def _noise_ext_pallas(xf, noise, scale, multiplicative):
    N, feat = xf.shape
    rb, fb, grid = _noise_tiling(N, feat)
    kernel = functools.partial(_noise_ext_kernel, scale=float(scale),
                               multiplicative=bool(multiplicative))
    return pl.pallas_call(
        kernel,
        out_shape=jax.ShapeDtypeStruct((N, feat), xf.dtype),
        grid=grid,
        in_specs=[pl.BlockSpec((rb, fb), lambda i, j: (i, j)),
                  pl.BlockSpec((rb, fb), lambda i, j: (i, j))],
        out_specs=pl.BlockSpec((rb, fb), lambda i, j: (i, j)),
        compiler_params=pltpu.CompilerParams(
            dimension_semantics=("parallel", "parallel")),
    )(xf, noise)


_HW_PRNG_AVAILABLE = None


def _hw_prng_ok():
    """One-time probe: does the in-kernel HW PRNG path lower & run here?"""
    global _HW_PRNG_AVAILABLE
    if _HW_PRNG_AVAILABLE is None:
        try:
            probe = jnp.zeros((8, 256), jnp.float32)
            jax.block_until_ready(_noise_prng_pallas(probe, 0, 1.0, False))
            _HW_PRNG_AVAILABLE = True
        except Exception:
            _HW_PRNG_AVAILABLE = False
    return _HW_PRNG_AVAILABLE


def noise_aug(x, scale, multiplicative, seed):
    N = x.shape[0]
    feat = int(np.prod(x.shape[1:]))
    xf = x.reshape(N, feat)
    if _hw_prng_ok():
        out = _noise_prng_pallas(xf, seed, scale, multiplicative)
    else:
        # TODO(synk): HW PRNG path unavailable in this environment; fall back to an external
        # normal stream drawn with jax.random (one extra HBM read per element).
        noise = jax.random.normal(jax.random.PRNGKey(seed), xf.shape, dtype=xf.dtype)
        out = _noise_ext_pallas(xf, noise, scale, multiplicative)
    return out.reshape(x.shape)


# ----------------------------------------------------------------------------
# mixup: batch resident per feat-block, in-VMEM partner gather, one blended store
# ----------------------------------------------------------------------------
def _mixup_kernel(perm_ref, x_ref, o_ref, *, alpha, n_rows):
    x1 = x_ref[...]                                        # (N, fb)
    # TODO(synk): replace the per-row dynamic slices with a single jnp.take sublane gather once
    # dynamic_gather lowering is universally available; the blend/store is already lane-dense.
    rows = [x_ref[pl.ds(perm_ref[i], 1), :] for i in range(n_rows)]
    x2 = jnp.concatenate(rows, axis=0)                     # (N, fb) permuted partner
    o_ref[...] = (alpha * x1 + (1.0 - alpha) * x2).astype(o_ref.dtype)


def mixup_aug(x, perm, alpha):
    N = x.shape[0]
    feat = int(np.prod(x.shape[1:]))
    xf = x.reshape(N, feat)
    fb = _pick_tile(feat, 2048, 128)       # whole batch on the sublane axis, tile only the lanes
    grid = (feat // fb,)
    kernel = functools.partial(_mixup_kernel, alpha=float(alpha), n_rows=N)
    out = pl.pallas_call(
        kernel,
        out_shape=jax.ShapeDtypeStruct((N, feat), x.dtype),
        grid_spec=pltpu.PrefetchScalarGridSpec(
            num_scalar_prefetch=1,
            grid=grid,
            in_specs=[pl.BlockSpec((N, fb), lambda j, p: (0, j))],
            out_specs=pl.BlockSpec((N, fb), lambda j, p: (0, j)),
        ),
        compiler_params=pltpu.CompilerParams(dimension_semantics=("parallel",)),
    )(jnp.asarray(perm, jnp.int32), xf)
    return out.reshape(x.shape)


# ----------------------------------------------------------------------------
# sampling-matrix builders (numpy)
# ----------------------------------------------------------------------------
def _resize_matrix(out_size, in_size):
    """Bilinear interpolation matrix (align_corners=False)."""
    o = np.arange(out_size, dtype=np.float64)
    src = np.clip((o + 0.5) * in_size / out_size - 0.5, 0.0, in_size - 1.0)
    i0 = np.floor(src).astype(np.int64)
    i1 = np.minimum(i0 + 1, in_size - 1)
    w1 = src - i0
    M = np.zeros((out_size, in_size), np.float32)
    oi = o.astype(np.int64)
    np.add.at(M, (oi, i0), 1.0 - w1)
    np.add.at(M, (oi, i1), w1)
    return M


def _rotation_mats(rng, N, H, W, deg_lo=-90.0, deg_hi=90.0):
    """Per-sample bilinear rotation sampling matrices, transposed: (N, H*W, H*W)."""
    yo, xo = np.meshgrid(np.arange(H), np.arange(W), indexing="ij")
    cy, cx = (H - 1) / 2.0, (W - 1) / 2.0
    dx = (xo - cx).ravel()
    dy = (yo - cy).ravel()
    oidx = (yo * W + xo).ravel()
    St = np.zeros((N, H * W, H * W), np.float32)
    for n in range(N):
        th = np.deg2rad(rng.uniform(deg_lo, deg_hi))
        c, si = np.cos(th), np.sin(th)
        xs = c * dx + si * dy + cx
        ys = -si * dx + c * dy + cy
        x0 = np.floor(xs).astype(np.int64)
        y0 = np.floor(ys).astype(np.int64)
        for ddy in (0, 1):
            for ddx in (0, 1):
                xx = x0 + ddx
                yy = y0 + ddy
                w = (1.0 - np.abs(xs - xx)) * (1.0 - np.abs(ys - yy))
                ok = (xx >= 0) & (xx < W) & (yy >= 0) & (yy < H) & (w > 0)
                np.add.at(St[n], (yy[ok] * W + xx[ok], oidx[ok]), w[ok])
    return St


# ----------------------------------------------------------------------------
# HiddenAug_v1 (JAX / Pallas)
# ----------------------------------------------------------------------------
class HiddenAugV1Pallas:
    BASIC = ("identity", "hflip", "crop1", "crop2", "rcrop1", "rcrop2", "rotate")

    def __init__(self, img_size, p_noisy=0.5, aug_order="parallel",
                 noisy_list=("gaussian", "speckle", "mixup"), seed=0):
        self.img_size = img_size
        self.size1 = int(img_size * np.sqrt(0.3))
        self.size2 = int(img_size * np.sqrt(0.7))
        self.p_noisy = p_noisy
        self.aug_order = aug_order
        self.noisy_list = list(noisy_list)
        self.rng = np.random.default_rng(seed)
        # parameterisation mirroring the torch module's module lists
        self.speckle_scales = (0.05, 0.1)
        self.gaussian_scales = (0.06, 0.1)
        self.mixup_alphas = (0.9, 0.95)
        # batch-independent interpolation matrices: built & uploaded ONCE, cached in bf16.
        # NOTE: RandomResizedCrop with scale=(1.0, 1.0) degenerates to a full-image resize.
        self._resize = {}
        for tag, s in (("rcrop1", self.size1), ("rcrop2", self.size2)):
            A = _resize_matrix(s, img_size)
            self._resize[tag] = (jnp.asarray(A, dtype=_MXU_DTYPE),
                                 jnp.asarray(np.ascontiguousarray(A.T), dtype=_MXU_DTYPE))

    # ---- basic (geometric) branch --------------------------------------------------
    def _apply_basic(self, name, x):
        N, C, H, W = x.shape
        if name == "identity":
            return x                                   # pure data movement: no kernel, no DMA
        if name == "hflip":
            return hflip_aug(x)                        # exact lane reverse in XLA (review item)
        if name in ("crop1", "crop2"):
            s = self.size1 if name == "crop1" else self.size2
            ty = self.rng.integers(0, H - s + 1, size=N)
            tx = self.rng.integers(0, W - s + 1, size=N)
            return crop_aug(x, ty, tx, s)              # DMA-only crop, offsets via scalar prefetch
        if name in ("rcrop1", "rcrop2"):
            a, bt = self._resize[name]
            return resize_aug(x, a, bt)
        if name == "rotate":
            # TODO(synk): angles sampled host-side and the dense operator rebuilt/uploaded per
            # call; replace with an in-kernel 4-tap bilinear gather to remove the H2D transfer.
            St = _rotation_mats(self.rng, N, H, W)
            return rotate_aug(x, jnp.asarray(St, dtype=_MXU_DTYPE))
        raise ValueError(name)

    # ---- noisy branch ----------------------------------------------------------------
    def _apply_noisy(self, name, x):
        idx = int(self.rng.integers(0, 2))
        seed = int(self.rng.integers(0, 2**31 - 1))
        if name == "gaussian":
            return noise_aug(x, self.gaussian_scales[idx], False, seed)
        if name == "speckle":
            return noise_aug(x, self.speckle_scales[idx], True, seed)
        if name == "mixup":
            perm = self.rng.permutation(x.shape[0])
            return mixup_aug(x, perm, self.mixup_alphas[idx])
        # TODO(synk): DiffJPEG (DCT/quant round-trip) and DiffShot (PIL round-trip + numpy Poisson
        # sampling) have no clean Pallas equivalent here.
        raise NotImplementedError(f"noisy aug '{name}' not implemented")

    # ---- forward ---------------------------------------------------------------------
    def __call__(self, x):
        if self.aug_order != "parallel":
            raise NotImplementedError
        if self.rng.random() < 1.0 - self.p_noisy:
            name = self.rng.choice(self.BASIC)
            return self._apply_basic(str(name), x)
        aug_type = self.rng.choice(self.noisy_list)
        return self._apply_noisy(str(aug_type), x)


# ----------------------------------------------------------------------------
if __name__ == "__main__":
    key = jax.random.PRNGKey(0)
    # small NCHW image batch: N=2, C=3, H=W=16 (img_size=16 -> size1=8, size2=13)
    x = jax.random.normal(key, (2, 3, 16, 16), dtype=jnp.float32)

    aug = HiddenAugV1Pallas(img_size=16, p_noisy=0.5,
                            noisy_list=("gaussian", "speckle", "mixup"), seed=0)

    # random forward (same dispatch semantics as the torch module)
    y = aug(x)
    jax.block_until_ready(y)

    # deterministically exercise every implemented augmentation path once
    outs = [aug._apply_basic(name, x) for name in HiddenAugV1Pallas.BASIC]
    outs += [aug._apply_noisy(name, x) for name in ("gaussian", "speckle", "mixup")]
    jax.block_until_ready(outs)

    print("KERNEL_OK")
</pallas_src>

<mosaic_0001>
module attributes {stable_mosaic.version = 11 : i64} {
  func.func @_noise_prng_kernel(%arg0: i32, %arg1: i32, %arg2: memref<1xi32, #tpu.memory_space<smem>>, %arg3: memref<8x256xf32, #tpu.memory_space<vmem>>, %arg4: memref<8x256xf32, #tpu.memory_space<vmem>>) attributes {dimension_semantics = [#tpu.dimension_semantics<parallel>, #tpu.dimension_semantics<parallel>], iteration_bounds = array<i64: 1, 1>, scalar_prefetch = 1 : i64, scratch_operands = 0 : i64, tpu.core_type = #tpu.core_type<tc>, window_params = [{transform_indices = @transform_0, window_bounds = array<i64: 8, 256>}, {transform_indices = @transform_1, window_bounds = array<i64: 8, 256>}]} {
    %c0 = arith.constant 0 : index
    %0 = memref.load %arg2[%c0] : memref<1xi32, #tpu.memory_space<smem>>
    %c1_i32 = arith.constant 1 : i32
    %1 = arith.muli %arg0, %c1_i32 : i32
    %2 = arith.addi %0, %1 : i32
    %3 = arith.addi %2, %arg1 : i32
    "tpu.prng_set_seed_32"(%3) : (i32) -> ()
    %c0_0 = arith.constant 0 : index
    %c0_1 = arith.constant 0 : index
    %4 = vector.load %arg3[%c0_0, %c0_1] : memref<8x256xf32, #tpu.memory_space<vmem>>, vector<8x256xf32>
    %c0_i32 = arith.constant 0 : i32
    %c0_i32_2 = arith.constant 0 : i32
    %cst = arith.constant -0.99999994 : f32
    %cst_3 = arith.constant 1.000000e+00 : f32
    %5 = vector.broadcast %cst : f32 to vector<1x1xf32>
    %6 = vector.broadcast %cst_3 : f32 to vector<1x1xf32>
    %7 = "tpu.prng_random_bits"() : () -> vector<8x256xi32>
    %c9_i32 = arith.constant 9 : i32
    %8 = vector.broadcast %c9_i32 : i32 to vector<8x256xi32>
    %9 = arith.shrui %7, %8 : vector<8x256xi32>
    %c1065353216_i32 = arith.constant 1065353216 : i32
    %10 = vector.broadcast %c1065353216_i32 : i32 to vector<8x256xi32>
    %11 = arith.ori %9, %10 : vector<8x256xi32>
    %12 = tpu.bitcast %11 : vector<8x256xi32> -> vector<8x256xf32>
    %cst_4 = arith.constant 1.000000e+00 : f32
    %13 = vector.broadcast %cst_4 : f32 to vector<8x256xf32>
    %14 = arith.subf %12, %13 : vector<8x256xf32>
    %15 = arith.subf %6, %5 : vector<1x1xf32>
    %16 = vector.broadcast %15 : vector<1x1xf32> to vector<8x256xf32>
    %17 = arith.mulf %14, %16 : vector<8x256xf32>
    %18 = vector.broadcast %5 : vector<1x1xf32> to vector<8x256xf32>
    %19 = arith.addf %17, %18 : vector<8x256xf32>
    %20 = vector.broadcast %5 : vector<1x1xf32> to vector<8x256xf32>
    %21 = arith.maximumf %20, %19 : vector<8x256xf32>
    %cst_5 = arith.constant 0.000000e+00 : f32
    %22 = vector.broadcast %cst_5 : f32 to vector<8x256xf32>
    %23 = arith.subf %22, %21 : vector<8x256xf32>
    %24 = arith.mulf %21, %23 : vector<8x256xf32>
    %25 = math.log1p %24 : vector<8x256xf32>
    %cst_6 = arith.constant 0.000000e+00 : f32
    %26 = vector.broadcast %cst_6 : f32 to vector<8x256xf32>
    %27 = arith.subf %26, %25 : vector<8x256xf32>
    %cst_7 = arith.constant 5.000000e+00 : f32
    %28 = vector.broadcast %cst_7 : f32 to vector<8x256xf32>
    %29 = arith.cmpf olt, %27, %28 : vector<8x256xf32>
    %cst_8 = arith.constant 2.500000e+00 : f32
    %30 = vector.broadcast %cst_8 : f32 to vector<8x256xf32>
    %31 = arith.subf %27, %30 : vector<8x256xf32>
    %32 = math.sqrt %27 : vector<8x256xf32>
    %cst_9 = arith.constant 3.000000e+00 : f32
    %33 = vector.broadcast %cst_9 : f32 to vector<8x256xf32>
    %34 = arith.subf %32, %33 : vector<8x256xf32>
    %35 = arith.select %29, %31, %34 : vector<8x256xi1>, vector<8x256xf32>
    %cst_10 = arith.constant 2.81022636E-8 : f32
    %cst_11 = arith.constant -2.00214257E-4 : f32
    %36 = vector.broadcast %cst_10 : f32 to vector<8x256xf32>
    %37 = vector.broadcast %cst_11 : f32 to vector<8x256xf32>
    %38 = arith.select %29, %36, %37 : vector<8x256xi1>, vector<8x256xf32>
    %cst_12 = arith.constant 3.43273939E-7 : f32
    %cst_13 = arith.constant 1.00950558E-4 : f32
    %39 = vector.broadcast %cst_12 : f32 to vector<8x256xf32>
    %40 = vector.broadcast %cst_13 : f32 to vector<8x256xf32>
    %41 = arith.select %29, %39, %40 : vector<8x256xi1>, vector<8x256xf32>
    %42 = arith.mulf %38, %35 : vector<8x256xf32>
    %43 = arith.addf %41, %42 : vector<8x256xf32>
    %cst_14 = arith.constant -3.5233877E-6 : f32
    %cst_15 = arith.constant 0.00134934322 : f32
    %44 = vector.broadcast %cst_14 : f32 to vector<8x256xf32>
    %45 = vector.broadcast %cst_15 : f32 to vector<8x256xf32>
    %46 = arith.select %29, %44, %45 : vector<8x256xi1>, vector<8x256xf32>
    %47 = arith.mulf %43, %35 : vector<8x256xf32>
    %48 = arith.addf %46, %47 : vector<8x256xf32>
    %cst_16 = arith.constant -4.39150654E-6 : f32
    %cst_17 = arith.constant -0.00367342844 : f32
    %49 = vector.broadcast %cst_16 : f32 to vector<8x256xf32>
    %50 = vector.broadcast %cst_17 : f32 to vector<8x256xf32>
    %51 = arith.select %29, %49, %50 : vector<8x256xi1>, vector<8x256xf32>
    %52 = arith.mulf %48, %35 : vector<8x256xf32>
    %53 = arith.addf %51, %52 : vector<8x256xf32>
    %cst_18 = arith.constant 2.1858087E-4 : f32
    %cst_19 = arith.constant 0.00573950773 : f32
    %54 = vector.broadcast %cst_18 : f32 to vector<8x256xf32>
    %55 = vector.broadcast %cst_19 : f32 to vector<8x256xf32>
    %56 = arith.select %29, %54, %55 : vector<8x256xi1>, vector<8x256xf32>
    %57 = arith.mulf %53, %35 : vector<8x256xf32>
    %58 = arith.addf %56, %57 : vector<8x256xf32>
    %cst_20 = arith.constant -0.00125372503 : f32
    %cst_21 = arith.constant -0.0076224613 : f32
    %59 = vector.broadcast %cst_20 : f32 to vector<8x256xf32>
    %60 = vector.broadcast %cst_21 : f32 to vector<8x256xf32>
    %61 = arith.select %29, %59, %60 : vector<8x256xi1>, vector<8x256xf32>
    %62 = arith.mulf %58, %35 : vector<8x256xf32>
    %63 = arith.addf %61, %62 : vector<8x256xf32>
    %cst_22 = arith.constant -0.00417768164 : f32
    %cst_23 = arith.constant 0.00943887047 : f32
    %64 = vector.broadcast %cst_22 : f32 to vector<8x256xf32>
    %65 = vector.broadcast %cst_23 : f32 to vector<8x256xf32>
    %66 = arith.select %29, %64, %65 : vector<8x256xi1>, vector<8x256xf32>
    %67 = arith.mulf %63, %35 : vector<8x256xf32>
    %68 = arith.addf %66, %67 : vector<8x256xf32>
    %cst_24 = arith.constant 0.246640727 : f32
    %cst_25 = arith.constant 1.00167406 : f32
    %69 = vector.broadcast %cst_24 : f32 to vector<8x256xf32>
    %70 = vector.broadcast %cst_25 : f32 to vector<8x256xf32>
    %71 = arith.select %29, %69, %70 : vector<8x256xi1>, vector<8x256xf32>
    %72 = arith.mulf %68, %35 : vector<8x256xf32>
    %73 = arith.addf %71, %72 : vector<8x256xf32>
    %cst_26 = arith.constant 1.50140941 : f32
    %cst_27 = arith.constant 2.83297682 : f32
    %74 = vector.broadcast %cst_26 : f32 to vector<8x256xf32>
    %75 = vector.broadcast %cst_27 : f32 to vector<8x256xf32>
    %76 = arith.select %29, %74, %75 : vector<8x256xi1>, vector<8x256xf32>
    %77 = arith.mulf %73, %35 : vector<8x256xf32>
    %78 = arith.addf %76, %77 : vector<8x256xf32>
    %79 = math.absf %21 : vector<8x256xf32>
    %cst_28 = arith.constant 1.000000e+00 : f32
    %80 = vector.broadcast %cst_28 : f32 to vector<8x256xf32>
    %81 = arith.cmpf oeq, %79, %80 : vector<8x256xf32>
    %cst_29 = arith.constant 0x7F800000 : f32
    %82 = vector.broadcast %cst_29 : f32 to vector<8x256xf32>
    %83 = arith.mulf %82, %21 : vector<8x256xf32>
    %84 = arith.mulf %78, %21 : vector<8x256xf32>
    %85 = arith.select %81, %83, %84 : vector<8x256xi1>, vector<8x256xf32>
    %cst_30 = arith.constant 1.41421354 : f32
    %86 = vector.broadcast %cst_30 : f32 to vector<8x256xf32>
    %87 = arith.mulf %86, %85 : vector<8x256xf32>
    %cst_31 = arith.constant 1.000000e+00 : f32
    %88 = vector.broadcast %cst_31 : f32 to vector<8x256xf32>
    %89 = arith.mulf %87, %88 : vector<8x256xf32>
    %90 = arith.addf %4, %89 : vector<8x256xf32>
    %c0_32 = arith.constant 0 : index
    %c0_33 = arith.constant 0 : index
    %91 = vector.load %arg4[%c0_32, %c0_33] : memref<8x256xf32, #tpu.memory_space<vmem>>, vector<8x256xf32>
    tpu.vector_store %arg4[%c0_32, %c0_33], %90 {strides = array<i32>} : memref<8x256xf32, #tpu.memory_space<vmem>>, vector<8x256xf32>,
    return
  }
  func.func @transform_0(%arg0: i32, %arg1: i32, %arg2: memref<1xi32, #tpu.memory_space<smem>>) -> (i32, i32) {
    %c0_i32 = arith.constant 0 : i32
    return %arg0, %arg1 : i32, i32
  }
  func.func @transform_1(%arg0: i32, %arg1: i32, %arg2: memref<1xi32, #tpu.memory_space<smem>>) -> (i32, i32) {
    %c0_i32 = arith.constant 0 : i32
    return %arg0, %arg1 : i32, i32
  }
}

module attributes {stable_mosaic.version = 11 : i64} {
  func.func @_noise_ext_kernel(%arg0: i32, %arg1: i32, %arg2: memref<2x768xf32, #tpu.memory_space<vmem>>, %arg3: memref<2x768xf32, #tpu.memory_space<vmem>>, %arg4: memref<2x768xf32, #tpu.memory_space<vmem>>) attributes {dimension_semantics = [#tpu.dimension_semantics<parallel>, #tpu.dimension_semantics<parallel>], iteration_bounds = array<i64: 1, 1>, scalar_prefetch = 0 : i64, scratch_operands = 0 : i64, tpu.core_type = #tpu.core_type<tc>, window_params = [{transform_indices = @transform_0, window_bounds = array<i64: 2, 768>}, {transform_indices = @transform_1, window_bounds = array<i64: 2, 768>}, {transform_indices = @transform_2, window_bounds = array<i64: 2, 768>}]} {
    %c0 = arith.constant 0 : index
    %c0_0 = arith.constant 0 : index
    %0 = vector.load %arg2[%c0, %c0_0] : memref<2x768xf32, #tpu.memory_space<vmem>>, vector<2x768xf32>
    %c0_1 = arith.constant 0 : index
    %c0_2 = arith.constant 0 : index
    %1 = vector.load %arg3[%c0_1, %c0_2] : memref<2x768xf32, #tpu.memory_space<vmem>>, vector<2x768xf32>
    %cst = arith.constant 5.000000e-02 : f32
    %2 = vector.broadcast %cst : f32 to vector<2x768xf32>
    %3 = arith.mulf %1, %2 : vector<2x768xf32>
    %4 = arith.mulf %0, %3 : vector<2x768xf32>
    %5 = arith.addf %0, %4 : vector<2x768xf32>
    %c0_3 = arith.constant 0 : index
    %c0_4 = arith.constant 0 : index
    %6 = vector.load %arg4[%c0_3, %c0_4] : memref<2x768xf32, #tpu.memory_space<vmem>>, vector<2x768xf32>
    tpu.vector_store %arg4[%c0_3, %c0_4], %5 {strides = array<i32>} : memref<2x768xf32, #tpu.memory_space<vmem>>, vector<2x768xf32>,
    return
  }
  func.func @transform_0(%arg0: i32, %arg1: i32) -> (i32, i32) {
    %c0_i32 = arith.constant 0 : i32
    return %arg0, %arg1 : i32, i32
  }
  func.func @transform_1(%arg0: i32, %arg1: i32) -> (i32, i32) {
    %c0_i32 = arith.constant 0 : i32
    return %arg0, %arg1 : i32, i32
  }
  func.func @transform_2(%arg0: i32, %arg1: i32) -> (i32, i32) {
    %c0_i32 = arith.constant 0 : i32
    return %arg0, %arg1 : i32, i32
  }
}

</mosaic_0001>

<bundles_post_ra>
// kernel: tpu_custom_call.1
= control target key start
LH: loop header
LB: loop body
LE: loop exit
PB: predicated region body
PF: predicated region fallthrough
CT: control target
= control target key end

     0   :  { %8 = vsyncpa [#allocation5], 0  ;;  %s488_s0 = inlined_call_operand.<no memory space> [shape: s32[1], index: 0, kind: input, shape index: {}]   ;;  %s489_s1 = inlined_call_operand.hbm [shape: f32[8,256], index: 1, kind: input, shape index: {}]   ;;  %s490_s2 = inlined_call_operand.hbm [shape: f32[8,256], index: 2, kind: output, shape index: {}]  }
   0x1   :  { %9 = vsyncpa [#allocation6], 0  ;;  %s362_s9 = smov [#allocation4]  }
   0x2   :  { %s16_s10 = sshll.u32 %s362_s9, 4  ;;  %s17_s10 = int_to_ptr.vmem [resolvable:$true] %s16_s10 }
   0x3   :  { %s326_s11 = scalar_lea.vmem %s17_s10, 256  ;;  %p331_p1 = scmp.lt.s32.totalorder %s17_s10, %s17_s10 }
   0x4   :  { %p327_p0 = scmp.ne.s32.totalorder %s17_s10, %s326_s11  ;;  %p332_p2 = scmp.lt.s32.totalorder %s326_s11, %s326_s11 }
   0x6   :  { %p333_p3 = por %p332_p2, %p331_p1 }
   0x8   :  { %p334_p4 = pnand %p333_p3, %p327_p0 }
   0xa   :  { %337 = shalt.err (!%p334_p4)
}
   0xb   :  { %19 = dma.hbm_to_vmem [thread:$0]  %s489_s1, 256, %s17_s10, [#allocation5]   ;;  %v26_v0 = vlaneseq  ;;  %v394_v1 = vstv %s488_s0 }
   0xc   :  { %358 = dma.done.wait [#allocation5], 256  }
   0xd   :  { %359 = vsyncadd [#allocation5], 4294967040  ;;  %v30_v2 = vadd.s32 %v394_v1, %v26_v0  ;;  %v28_v17 = vxor.u32 %v394_v1, %v394_v1  ;;  %s372_s0 = smov [#allocation7]  }
   0xe   :  { %s284_s1 = sshll.u32 %s372_s0, 4  ;;  %s285_s1 = int_to_ptr.vmem [resolvable:$true] %s284_s1 }
   0xf   :  { %v31_v3 = vadd.s32 %v30_v2, %v30_v2  ;;  %v32_v4 = vshll.u32 %v30_v2, 13  ;;  %v33_v5 = vshrl.u32 %v30_v2, 19  ;;  %v399_v22 = vxor.u32 466688986, %v28_v17  ;;  %s338_s16 = scalar_lea.vmem %s285_s1, 256  ;;  %p343_p6 = scmp.lt.s32.totalorder %s285_s1, %s285_s1 }
  0x10   :  { %p339_p5 = scmp.ne.s32.totalorder %s285_s1, %s338_s16  ;;  %p344_p7 = scmp.lt.s32.totalorder %s338_s16, %s338_s16 }
  0x11   :  { %v34_v6 = vor.u32 %v33_v5, %v32_v4 }
  0x12   :  { %p345_p8 = por %p344_p7, %p343_p6 }
  0x13   :  { %v35_v7 = vxor.u32 %v34_v6, %v31_v3 }
  0x14   :  { %p346_p9 = pnand %p345_p8, %p339_p5 }
  0x15   :  { %v36_v8 = vadd.s32 %v35_v7, %v31_v3  ;;  %v37_v9 = vshll.u32 %v35_v7, 15  ;;  %v38_v10 = vshrl.u32 %v35_v7, 17 }
  0x17   :  { %v39_v11 = vor.u32 %v38_v10, %v37_v9 }
  0x19   :  { %v40_v12 = vxor.u32 %v39_v11, %v36_v8 }
  0x1b   :  { %v41_v13 = vadd.s32 %v40_v12, %v36_v8  ;;  %v42_v14 = vshll.u32 %v40_v12, 26  ;;  %v43_v15 = vshrl.u32 %v40_v12, 6 }
  0x1d   :  { %v44_v16 = vor.u32 %v43_v15, %v42_v14 }
  0x1f   :  { %v45_v18 = vxor.u32 %v44_v16, %v41_v13 }
  0x21   :  { %v46_v19 = vadd.s32 %v45_v18, %v41_v13  ;;  %v47_v20 = vshll.u32 %v45_v18, 6  ;;  %v48_v21 = vshrl.u32 %v45_v18, 26 }
  0x23   :  { %v49_v23 = vor.u32 %v48_v21, %v47_v20  ;;  %v51_v25 = vadd.s32 %v46_v19, %v394_v1 }
  0x25   :  { %v50_v24 = vxor.u32 %v49_v23, %v46_v19 }
  0x27   :  { %v52_v26 = vadd.s32 %v50_v24, %v399_v22 }
  0x29   :  { %v53_v27 = vadd.s32 1, %v52_v26 }
  0x2b   :  { %v54_v28 = vadd.s32 %v53_v27, %v51_v25  ;;  %v55_v29 = vshll.u32 %v53_v27, 17  ;;  %v56_v30 = vshrl.u32 %v53_v27, 15 }
  0x2d   :  { %v57_v31 = vor.u32 %v56_v30, %v55_v29 }
  0x2f   :  { %v58_v32 = vxor.u32 %v57_v31, %v54_v28 }
  0x31   :  { %v59_v33 = vadd.s32 %v58_v32, %v54_v28  ;;  %v60_v34 = vshll.u32 %v58_v32, 29  ;;  %v61_v35 = vshrl.u32 %v58_v32, 3 }
  0x33   :  { %v62_v36 = vor.u32 %v61_v35, %v60_v34 }
  0x35   :  { %v63_v37 = vxor.u32 %v62_v36, %v59_v33 }
  0x37   :  { %v64_v38 = vadd.s32 %v63_v37, %v59_v33  ;;  %v65_v39 = vshll.u32 %v63_v37, 16  ;;  %v66_v40 = vshrl.u32 %v63_v37, 16 }
  0x39   :  { %v67_v41 = vor.u32 %v66_v40, %v65_v39 }
  0x3b   :  { %v68_v42 = vxor.u32 %v67_v41, %v64_v38 }
  0x3d   :  { %v69_v43 = vadd.s32 %v68_v42, %v64_v38  ;;  %v70_v44 = vshll.u32 %v68_v42, 24  ;;  %v71_v45 = vshrl.u32 %v68_v42, 8 }
  0x3f   :  { %v72_v46 = vor.u32 %v71_v45, %v70_v44  ;;  %v74_v48 = vadd.s32 %v69_v43, %v399_v22 }
  0x41   :  { %v73_v47 = vxor.u32 %v72_v46, %v69_v43 }
  0x43   :  { %v75_v49 = vadd.s32 %v73_v47, %v394_v1 }
  0x45   :  { %v76_v50 = vadd.s32 2, %v75_v49 }
  0x47   :  { %v77_v51 = vadd.s32 %v76_v50, %v74_v48  ;;  %v78_v52 = vshll.u32 %v76_v50, 13  ;;  %v79_v53 = vshrl.u32 %v76_v50, 19 }
  0x49   :  { %v80_v54 = vor.u32 %v79_v53, %v78_v52 }
  0x4b   :  { %v81_v55 = vxor.u32 %v80_v54, %v77_v51 }
  0x4d   :  { %v82_v56 = vadd.s32 %v81_v55, %v77_v51  ;;  %v83_v57 = vshll.u32 %v81_v55, 15  ;;  %v84_v58 = vshrl.u32 %v81_v55, 17 }
  0x4f   :  { %v85_v59 = vor.u32 %v84_v58, %v83_v57 }
  0x51   :  { %v86_v60 = vxor.u32 %v85_v59, %v82_v56 }
  0x53   :  { %v87_v61 = vadd.s32 %v86_v60, %v82_v56  ;;  %v88_v62 = vshll.u32 %v86_v60, 26  ;;  %v89_v63 = vshrl.u32 %v86_v60, 6 }
  0x55   :  { %v90_v0 = vor.u32 %v89_v63, %v88_v62 }
  0x57   :  { %v91_v2 = vxor.u32 %v90_v0, %v87_v61 }
  0x59   :  { %v92_v3 = vadd.s32 %v91_v2, %v87_v61  ;;  %v93_v4 = vshll.u32 %v91_v2, 6  ;;  %v94_v5 = vshrl.u32 %v91_v2, 26 }
  0x5b   :  { %v95_v6 = vor.u32 %v94_v5, %v93_v4  ;;  %v97_v8 = vadd.s32 %v92_v3, %v394_v1 }
  0x5d   :  { %v96_v7 = vxor.u32 %v95_v6, %v92_v3 }
  0x5f   :  { %v98_v9 = vadd.s32 %v96_v7, %v394_v1 }
  0x61   :  { %v99_v10 = vadd.s32 3, %v98_v9 }
  0x63   :  { %v100_v11 = vadd.s32 %v99_v10, %v97_v8  ;;  %v101_v12 = vshll.u32 %v99_v10, 17  ;;  %v102_v13 = vshrl.u32 %v99_v10, 15 }
  0x65   :  { %v103_v14 = vor.u32 %v102_v13, %v101_v12 }
  0x67   :  { %v104_v15 = vxor.u32 %v103_v14, %v100_v11 }
  0x69   :  { %v105_v16 = vadd.s32 %v104_v15, %v100_v11  ;;  %v106_v17 = vshll.u32 %v104_v15, 29  ;;  %v107_v18 = vshrl.u32 %v104_v15, 3 }
  0x6b   :  { %v108_v19 = vor.u32 %v107_v18, %v106_v17 }
  0x6d   :  { %v109_v20 = vxor.u32 %v108_v19, %v105_v16 }
  0x6f   :  { %v110_v21 = vadd.s32 %v109_v20, %v105_v16  ;;  %v111_v23 = vshll.u32 %v109_v20, 16  ;;  %v112_v24 = vshrl.u32 %v109_v20, 16 }
  0x71   :  { %v113_v25 = vor.u32 %v112_v24, %v111_v23 }
  0x73   :  { %v114_v26 = vxor.u32 %v113_v25, %v110_v21 }
  0x75   :  { %v115_v27 = vadd.s32 %v114_v26, %v110_v21  ;;  %v116_v28 = vshll.u32 %v114_v26, 24  ;;  %v117_v29 = vshrl.u32 %v114_v26, 8 }
  0x77   :  { %v118_v30 = vor.u32 %v117_v29, %v116_v28  ;;  %v120_v32 = vadd.s32 %v115_v27, %v394_v1 }
  0x79   :  { %v119_v31 = vxor.u32 %v118_v30, %v115_v27 }
  0x7b   :  { %v121_v33 = vadd.s32 %v119_v31, %v399_v22 }
  0x7d   :  { %v122_v34 = vadd.s32 4, %v121_v33 }
  0x7f   :  { %v123_v35 = vadd.s32 %v122_v34, %v120_v32  ;;  %v124_v36 = vshll.u32 %v122_v34, 13  ;;  %v125_v37 = vshrl.u32 %v122_v34, 19 }
  0x81   :  { %v126_v38 = vor.u32 %v125_v37, %v124_v36 }
  0x83   :  { %v127_v39 = vxor.u32 %v126_v38, %v123_v35 }
  0x85   :  { %v128_v40 = vadd.s32 %v127_v39, %v123_v35  ;;  %v129_v41 = vshll.u32 %v127_v39, 15  ;;  %v130_v42 = vshrl.u32 %v127_v39, 17 }
  0x87   :  { %v131_v43 = vor.u32 %v130_v42, %v129_v41 }
  0x89   :  { %v132_v44 = vxor.u32 %v131_v43, %v128_v40 }
  0x8b   :  { %v133_v45 = vadd.s32 %v132_v44, %v128_v40  ;;  %v134_v46 = vshll.u32 %v132_v44, 26  ;;  %v135_v47 = vshrl.u32 %v132_v44, 6 }
  0x8d   :  { %v136_v48 = vor.u32 %v135_v47, %v134_v46  ;;  %v363_v46 = vmov -0.00020021426  }
  0x8f   :  { %v137_v49 = vxor.u32 %v136_v48, %v133_v45 }
  0x91   :  { %v138_v50 = vadd.s32 %v137_v49, %v133_v45  ;;  %v139_v51 = vshll.u32 %v137_v49, 6  ;;  %v140_v52 = vshrl.u32 %v137_v49, 26 }
  0x93   :  { %v141_v53 = vor.u32 %v140_v52, %v139_v51  ;;  %v143_v55 = vadd.s32 %v138_v50, %v399_v22  ;;  %v364_v51 = vmov 0.00010095056  }
  0x95   :  { %v142_v54 = vxor.u32 %v141_v53, %v138_v50 }
  0x97   :  { %v144_v56 = vadd.s32 %v142_v54, %v394_v1 }
  0x99   :  { %v145_v57 = vadd.s32 5, %v144_v56 }
  0x9b   :  { %v146_v58 = vxor.u32 %v145_v57, %v143_v55 }
  0x9d   :  { %147 = set.rngseed %v146_v58  ;;  %v365_v58 = vmov 0.0013493432  }
  0x9e   :  { %v150_v59 = vrng }
  0x9f   :  { %v152_v60 = vshrl.u32 %v150_v59, 9  ;;  %v151_v61 = vrng }
  0xa0   :  { %v153_v62 = vshrl.u32 %v151_v61, 9 }
  0xa1   :  { %v154_v63 = vor.u32 1065353216, %v152_v60 }
  0xa2   :  { %v155_v0 = vor.u32 1065353216, %v153_v62 }
  0xa3   :  { %v293_v2 = vadd.f32 -1.0, %v154_v63 }
  0xa4   :  { %v294_v3 = vadd.f32 -1.0, %v155_v0 }
  0xa5   :  { %v160_v4 = vmul.f32 2.0, %v293_v2  ;;  %v366_v2 = vmov -0.0036734284  }
  0xa6   :  { %v161_v5 = vmul.f32 2.0, %v294_v3 }
  0xa7   :  { %v162_v6 = vadd.f32 -0.99999994, %v160_v4 }
  0xa8   :  { %v163_v7 = vadd.f32 -0.99999994, %v161_v5 }
  0xa9   :  { %v411_v8 = vmax.f32 %v162_v6, -0.99999994 }
  0xaa   :  { %v413_v22 = vmax.f32 %v163_v7, -0.99999994 }
  0xab   :  { %v166_v1 = vsub.f32 0.0, %v411_v8 }
  0xac   :  { %v167_v9 = vsub.f32 0.0, %v413_v22 }
  0xad   :  { %v168_v10 = vmul.f32 %v166_v1, %v411_v8 }
  0xae   :  { %v169_v11 = vmul.f32 %v167_v9, %v413_v22  ;;  %v367_v9 = vmov 0.0057395077  }
  0xaf   :  { %v170_v12 = vadd.f32 1.0, %v168_v10  ;;  %v173_v14 = vmul.f32 -0.5, %v168_v10  ;;  %v176_v17 = vand.u32 2147483647, %v168_v10 }
  0xb0   :  { %v179_v13 = vadd.f32 1.0, %v169_v11  ;;  %v182_v15 = vmul.f32 -0.5, %v169_v11  ;;  %v185_v19 = vand.u32 2147483647, %v169_v11 }
  0xb1   :  { %310 = vlog2.f32 %v170_v12  ;;  %v174_v16 = vadd.f32 1.0, %v173_v14  ;;  %vm177_vm0 = vcmp.lt.f32.partialorder %v176_v17, 0.0004427343 }
  0xb2   :  { %312 = vlog2.f32 %v179_v13  ;;  %v183_v18 = vadd.f32 1.0, %v182_v15  ;;  %vm186_vm1 = vcmp.lt.f32.partialorder %v185_v19, 0.0004427343 }
  0xb3   :  { %v175_v24 = vmul.f32 %v174_v16, %v168_v10  ;;  %v368_v16 = vmov -0.0076224613  }
  0xb4   :  { %v184_v26 = vmul.f32 %v183_v18, %v169_v11 }
  0xbe   :  { %v311_v20 = vpop.eup %310 }
  0xbf   :  { %v313_v21 = vpop.eup %312  ;;  %v172_v23 = vmul.f32 0.6931472, %v311_v20 }
  0xc0   :  { %v181_v25 = vmul.f32 0.6931472, %v313_v21 }
  0xc1   :  { %v178_v27 = vsel %vm177_vm0, %v175_v24, %v172_v23  ;;  %v369_v24 = vmov 0.0094388705  }
  0xc2   :  { %v419_v28 = vsub.f32 0.0, %v178_v27  ;;  %v187_v29 = vsel %vm186_vm1, %v184_v26, %v181_v25 }
  0xc3   :  { %v421_v30 = vsub.f32 0.0, %v187_v29 }
  0xc4   :  { %314 = vrsqrt.f32 %v419_v28  ;;  %vm196_vm2 = vcmp.eq.f32.partialorder %v419_v28, inf  ;;  %v199_v34 = vand.u32 2147483648, %v419_v28  ;;  %vm198_vm3 = vcmp.eq.f32.partialorder %v419_v28, 0.0 }
  0xc5   :  { %316 = vrsqrt.f32 %v421_v30  ;;  %vm190_vm4 = vcmp.lt.f32.partialorder %v419_v28, 5.0  ;;  %vm203_vm5 = vcmp.eq.f32.partialorder %v421_v30, inf  ;;  %v206_v38 = vand.u32 2147483648, %v421_v30 }
  0xc6   :  { %v295_v39 = vadd.f32 -2.5, %v419_v28  ;;  %vm205_vm6 = vcmp.eq.f32.partialorder %v421_v30, 0.0  ;;  %vm191_vm7 = vcmp.lt.f32.partialorder %v421_v30, 5.0  ;;  %v296_v43 = vadd.f32 -2.5, %v421_v30 }
  0xc7   :  { %v212_v47 = vsel %vm190_vm4, 2.8102264e-08, %v363_v46  ;;  %v213_v50 = vsel %vm191_vm7, 2.8102264e-08, %v363_v46  ;;  %v214_v52 = vsel %vm190_vm4, 3.4327394e-07, %v364_v51 }
  0xc8   :  { %v215_v55 = vsel %vm191_vm7, 3.4327394e-07, %v364_v51  ;;  %v220_v59 = vsel %vm190_vm4, -3.5233877e-06, %v365_v58  ;;  %v221_v62 = vsel %vm191_vm7, -3.5233877e-06, %v365_v58 }
  0xc9   :  { %v226_v3 = vsel %vm190_vm4, -4.3915065e-06, %v366_v2  ;;  %v227_v6 = vsel %vm191_vm7, -4.3915065e-06, %v366_v2  ;;  %v232_v10 = vsel %vm190_vm4, 0.00021858087, %v367_v9 }
  0xca   :  { %v233_v13 = vsel %vm191_vm7, 0.00021858087, %v367_v9  ;;  %v238_v17 = vsel %vm190_vm4, -0.001253725, %v368_v16  ;;  %v239_v20 = vsel %vm191_vm7, -0.001253725, %v368_v16 }
  0xcb   :  { %v244_v25 = vsel %vm190_vm4, -0.0041776816, %v369_v24  ;;  %v245_v29 = vsel %vm191_vm7, -0.0041776816, %v369_v24 }
  0xd1   :  { %v315_v31 = vpop.eup %314 }
  0xd2   :  { %v195_v32 = vmul.f32 %v315_v31, %v419_v28  ;;  %v317_v33 = vpop.eup %316 }
  0xd3   :  { %v202_v36 = vmul.f32 %v317_v33, %v421_v30  ;;  %v370_v33 = vmov 1.001674  }
  0xd4   :  { %v197_v35 = vsel %vm196_vm2, %v419_v28, %v195_v32 }
  0xd5   :  { %v200_v37 = vsel %vm198_vm3, %v199_v34, %v197_v35  ;;  %v204_v40 = vsel %vm203_vm5, %v421_v30, %v202_v36  ;;  %v250_v34 = vsel %vm190_vm4, 0.24664073, %v370_v33 }
  0xd6   :  { %v297_v41 = vadd.f32 -3.0, %v200_v37  ;;  %v207_v42 = vsel %vm205_vm6, %v206_v38, %v204_v40  ;;  %v251_v37 = vsel %vm191_vm7, 0.24664073, %v370_v33  ;;  %v371_v40 = vmov 2.8329768  }
  0xd7   :  { %v298_v44 = vadd.f32 -3.0, %v207_v42  ;;  %v262_v42 = vand.u32 2147483647, %v411_v8  ;;  %v257_v46 = vsel %vm191_vm7, 1.5014094, %v371_v40 }
  0xd8   :  { %v210_v45 = vsel %vm190_vm4, %v295_v39, %v297_v41  ;;  %v256_v41 = vsel %vm190_vm4, 1.5014094, %v371_v40 }
  0xd9   :  { %v216_v48 = vmul.f32 %v212_v47, %v210_v45  ;;  %v211_v49 = vsel %vm191_vm7, %v296_v43, %v298_v44  ;;  %v263_v47 = vand.u32 2147483647, %v413_v22  ;;  %vm264_vm8 = vcmp.eq.f32.partialorder %v262_v42, 1.0 }
  0xda   :  { %v217_v53 = vmul.f32 %v213_v50, %v211_v49  ;;  %v266_v50 = vmul.f32 inf, %v411_v8 }
  0xdb   :  { %v218_v54 = vadd.f32 %v216_v48, %v214_v52  ;;  %v267_v52 = vmul.f32 inf, %v413_v22  ;;  %vm265_vm9 = vcmp.eq.f32.partialorder %v263_v47, 1.0 }
  0xdc   :  { %v219_v56 = vadd.f32 %v217_v53, %v215_v55 }
  0xdd   :  { %v222_v57 = vmul.f32 %v218_v54, %v210_v45  ;;  %v149_v54 = vld [vmem:[#allocation4 + $0x8] sm:$0xff] }
  0xde   :  { %v223_v60 = vmul.f32 %v219_v56, %v211_v49 }
  0xdf   :  { %v224_v61 = vadd.f32 %v222_v57, %v220_v59 }
  0xe0   :  { %v225_v63 = vadd.f32 %v223_v60, %v221_v62 }
  0xe1   :  { %v228_v0 = vmul.f32 %v224_v61, %v210_v45 }
  0xe2   :  { %v229_v4 = vmul.f32 %v225_v63, %v211_v49 }
  0xe3   :  { %v230_v5 = vadd.f32 %v228_v0, %v226_v3 }
  0xe4   :  { %v231_v7 = vadd.f32 %v229_v4, %v227_v6 }
  0xe5   :  { %v234_v1 = vmul.f32 %v230_v5, %v210_v45 }
  0xe6   :  { %v235_v11 = vmul.f32 %v231_v7, %v211_v49 }
  0xe7   :  { %v236_v12 = vadd.f32 %v234_v1, %v232_v10 }
  0xe8   :  { %v237_v14 = vadd.f32 %v235_v11, %v233_v13 }
  0xe9   :  { %v240_v15 = vmul.f32 %v236_v12, %v210_v45 }
  0xea   :  { %v241_v18 = vmul.f32 %v237_v14, %v211_v49 }
  0xeb   :  { %v242_v19 = vadd.f32 %v240_v15, %v238_v17 }
  0xec   :  { %v243_v21 = vadd.f32 %v241_v18, %v239_v20 }
  0xed   :  { %v246_v23 = vmul.f32 %v242_v19, %v210_v45 }
  0xee   :  { %v247_v26 = vmul.f32 %v243_v21, %v211_v49 }
  0xef   :  { %v248_v27 = vadd.f32 %v246_v23, %v244_v25 }
  0xf0   :  { %v249_v31 = vadd.f32 %v247_v26, %v245_v29 }
  0xf1   :  { %v252_v32 = vmul.f32 %v248_v27, %v210_v45 }
  0xf2   :  { %v253_v35 = vmul.f32 %v249_v31, %v211_v49 }
  0xf3   :  { %v254_v36 = vadd.f32 %v252_v32, %v250_v34 }
  0xf4   :  { %v255_v38 = vadd.f32 %v253_v35, %v251_v37 }
  0xf5   :  { %v258_v39 = vmul.f32 %v254_v36, %v210_v45  ;;  %v148_v45 = vld [vmem:[#allocation4] sm:$0xff] }
  0xf6   :  { %v259_v43 = vmul.f32 %v255_v38, %v211_v49 }
  0xf7   :  { %v260_v44 = vadd.f32 %v258_v39, %v256_v41 }
  0xf8   :  { %v261_v48 = vadd.f32 %v259_v43, %v257_v46 }
  0xf9   :  { %v268_v51 = vmul.f32 %v260_v44, %v411_v8 }
  0xfa   :  { %v269_v28 = vmul.f32 %v261_v48, %v413_v22 }
  0xfb   :  { %v270_v53 = vsel %vm264_vm8, %v266_v50, %v268_v51 }
  0xfc   :  { %v272_v49 = vmul.f32 1.4142135, %v270_v53  ;;  %v271_v55 = vsel %vm265_vm9, %v267_v52, %v269_v28 }
  0xfd   :  { %v273_v30 = vmul.f32 1.4142135, %v271_v55 }
  0xfe   :  { %v274_v56 = vadd.f32 %v272_v49, %v148_v45 }
  0xff   :  { %v275_v57 = vadd.f32 %v273_v30, %v149_v54 }
 0x100   :  { %276 = vst [vmem:[#allocation7] sm:$0xff] %v274_v56 }
 0x101   :  { %277 = vst [vmem:[#allocation7 + $0x8] sm:$0xff] %v275_v57 }
 0x102   :  { %349 = shalt.err (!%p346_p9)
}
 0x103   :  { %287 = dma.vmem_to_hbm [thread:$0]  %s285_s1, 256, %s490_s2, [#allocation6]  }
 0x104   :  { %360 = dma.done.wait [#allocation6], 256  }
 0x105   :  { %361 = vsyncadd [#allocation6], 4294967040 }
 0x106   :  { %291 = vsyncpa [#allocation5], 1 }
 0x107   :  { %292 = vsyncpa [#allocation6], 1 }

// kernel: tpu_custom_call.1
= control target key start
LH: loop header
LB: loop body
LE: loop exit
PB: predicated region body
PF: predicated region fallthrough
CT: control target
= control target key end

     0   :  { %7 = vsyncpa [#allocation3], 0  ;;  %s160_s0 = inlined_call_operand.hbm [shape: f32[2,768], index: 0, kind: input, shape index: {}]   ;;  %s161_s1 = inlined_call_operand.hbm [shape: f32[2,768], index: 1, kind: input, shape index: {}]   ;;  %s162_s2 = inlined_call_operand.hbm [shape: f32[2,768], index: 2, kind: output, shape index: {}]  }
   0x1   :  { %8 = vsyncpa [#allocation6], 0 }
   0x2   :  { %9 = vsyncpa [#allocation4], 0  ;;  %s133_s9 = smov [#allocation2]   ;;  %s134_s11 = smov [#allocation5]  }
   0x3   :  { %s16_s10 = sshll.u32 %s133_s9, 4  ;;  %s26_s12 = sshll.u32 %s134_s11, 4  ;;  %s17_s10 = int_to_ptr.vmem [resolvable:$true] %s16_s10  ;;  %s27_s12 = int_to_ptr.vmem [resolvable:$true] %s26_s12 }
   0x4   :  { %s75_s13 = scalar_lea.vmem %s17_s10, 192  ;;  %p80_p1 = scmp.lt.s32.totalorder %s17_s10, %s17_s10 }
   0x5   :  { %p76_p0 = scmp.ne.s32.totalorder %s17_s10, %s75_s13  ;;  %p81_p2 = scmp.lt.s32.totalorder %s75_s13, %s75_s13 }
   0x7   :  { %p82_p3 = por %p81_p2, %p80_p1 }
   0x9   :  { %p83_p4 = pnand %p82_p3, %p76_p0 }
   0xb   :  { %86 = shalt.err (!%p83_p4)
}
   0xc   :  { %19 = dma.hbm_to_vmem [thread:$0]  %s160_s0, 192, %s17_s10, [#allocation3]  }
   0xd   :  { %s95_s16 = scalar_lea.vmem %s27_s12, 192  ;;  %p100_p6 = scmp.lt.s32.totalorder %s27_s12, %s27_s12 }
   0xe   :  { %p96_p5 = scmp.ne.s32.totalorder %s27_s12, %s95_s16  ;;  %p101_p7 = scmp.lt.s32.totalorder %s95_s16, %s95_s16 }
  0x10   :  { %p102_p8 = por %p101_p7, %p100_p6 }
  0x12   :  { %p103_p9 = pnand %p102_p8, %p96_p5 }
  0x14   :  { %106 = shalt.err (!%p103_p9)
}
  0x15   :  { %29 = dma.hbm_to_vmem [thread:$0]  %s161_s1, 192, %s27_s12, [#allocation6]  }
  0x16   :  { %127 = dma.done.wait [#allocation3], 192  }
  0x17   :  { %128 = vsyncadd [#allocation3], 4294967104 }
  0x18   :  { %129 = dma.done.wait [#allocation6], 192  }
  0x19   :  { %130 = vsyncadd [#allocation6], 4294967104  ;;  %v36_v0 = vld [vmem:[#allocation2] sm:$0xff]  ;;  %v38_v1 = vld [vmem:[#allocation5] sm:$0xff]  ;;  %s135_s0 = smov [#allocation7]  }
  0x1a   :  { %v40_v2 = vmul.f32 0.05, %v38_v1  ;;  %v37_v3 = vld [vmem:[#allocation2 + $0x8] sm:$0xf]  ;;  %v39_v4 = vld [vmem:[#allocation5 + $0x8] sm:$0xf] }
  0x1b   :  { %v41_v5 = vmul.f32 0.05, %v39_v4  ;;  %s54_s19 = sshll.u32 %s135_s0, 4  ;;  %s55_s19 = int_to_ptr.vmem [resolvable:$true] %s54_s19 }
  0x1c   :  { %v42_v6 = vmul.f32 %v40_v2, %v36_v0  ;;  %s107_s1 = scalar_lea.vmem %s55_s19, 192  ;;  %p112_p11 = scmp.lt.s32.totalorder %s55_s19, %s55_s19 }
  0x1d   :  { %v43_v7 = vmul.f32 %v41_v5, %v37_v3  ;;  %p108_p10 = scmp.ne.s32.totalorder %s55_s19, %s107_s1  ;;  %p113_p12 = scmp.lt.s32.totalorder %s107_s1, %s107_s1 }
  0x1e   :  { %v44_v8 = vadd.f32 %v42_v6, %v36_v0 }
  0x1f   :  { %v45_v9 = vadd.f32 %v43_v7, %v37_v3  ;;  %p114_p13 = por %p113_p12, %p112_p11 }
  0x20   :  { %46 = vst [vmem:[#allocation7] sm:$0xff] %v44_v8 }
  0x21   :  { %47 = vst [vmem:[#allocation7 + $0x8] sm:$0xf] %v45_v9  ;;  %p115_p0 = pnand %p114_p13, %p108_p10 }
  0x23   :  { %118 = shalt.err (!%p115_p0)
}
  0x24   :  { %57 = dma.vmem_to_hbm [thread:$0]  %s55_s19, 192, %s162_s2, [#allocation4]  }
  0x25   :  { %131 = dma.done.wait [#allocation4], 192  }
  0x26   :  { %132 = vsyncadd [#allocation4], 4294967104 }
  0x27   :  { %61 = vsyncpa [#allocation3], 1 }
  0x28   :  { %62 = vsyncpa [#allocation6], 1 }
  0x29   :  { %63 = vsyncpa [#allocation4], 1 }

</bundles_post_ra>
